<compile_context>
chip_gen: v7x
topology: tpu7x:2x2x1
jax: 0.10.0
libtpu: 0.0.40
codegen_flags: <defaults>
</compile_context>

<pallas_src>
import functools

import jax
import jax.numpy as jnp
from jax.experimental import pallas as pl
from jax.experimental.pallas import tpu as pltpu

_LANE = 128
_SUBLANE = 8
_MAX_SINGLE_K = 8192      # keep K un-tiled up to here (W is tiny; X tile dominates)
_MAX_BLOCK_ROWS = 1024    # 512-1024 row tiles are the measured HBM-roofline sweet spot


def _round_up(x, m):
    return ((x + m - 1) // m) * m


def _choose_tk(ft_in):
    """K tile: single block unless ft_in is very large; prefer divisors (no pad)."""
    if ft_in <= _MAX_SINGLE_K:
        return ft_in, False
    for cand in range(2048, 127, -128):        # multiples of 128, largest first
        if ft_in % cand == 0:
            return cand, False
    return 512, True                           # rare: fall back to zero-padding K


def _vmem_budget():
    """Generation-aware scoped-VMEM sizing (v7x: 64 MiB/TC, v5e/v6e: 128 MiB)."""
    try:
        cap = pltpu.get_tpu_info().vmem_capacity_bytes
    except Exception:                          # conservative fallback (v7x per-TC)
        cap = 64 * 1024 * 1024
    limit = min(cap // 2, 64 * 1024 * 1024)    # 32 MiB on v7x, 64 MiB on v5e/v6e
    return (limit * 3) // 4, limit             # (tile-sizing budget, vmem_limit_bytes)


def _logreg_kernel_single(x_ref, w_ref, b_ref, o_ref):
    # grid = (batch_tiles,); whole K in one MXU matmul, direct lane-narrow store.
    o_ref[...] = (
        jnp.dot(x_ref[...], w_ref[...], preferred_element_type=jnp.float32)
        + b_ref[...].astype(jnp.float32)
    ).astype(o_ref.dtype)


def _logreg_kernel_multi(x_ref, w_ref, b_ref, o_ref, acc_ref, *, tk):
    # grid = (batch_tiles, k_tiles); W is fully resident in VMEM, sliced per K step.
    k = pl.program_id(1)
    off = pl.multiple_of(k * tk, tk)
    part = jnp.dot(x_ref[...], w_ref[pl.ds(off, tk), :],
                   preferred_element_type=jnp.float32)

    @pl.when(k == 0)
    def _():
        acc_ref[...] = part            # set, not zero + accumulate

    @pl.when(k != 0)
    def _():
        acc_ref[...] += part

    @pl.when(k == pl.num_programs(1) - 1)
    def _():
        o_ref[...] = (acc_ref[...] + b_ref[...].astype(jnp.float32)).astype(o_ref.dtype)


def logreg_forward(seq, weight_t, bias, *, block_rows=None, block_k=None):
    """LogReg forward: seq @ weight_t + bias.

    seq:      (B, ft_in)            -- pass bf16 upstream for bf16 compute (no cast here)
    weight_t: (ft_in, nb_classes)   -- pre-transposed at init (no per-call transpose)
    bias:     (nb_classes,) or (1, nb_classes)
    """
    B, ft_in = seq.shape
    nb_classes = weight_t.shape[1]
    bias2d = bias.reshape(1, nb_classes)
    out_dtype = seq.dtype
    x_bytes = jnp.dtype(seq.dtype).itemsize
    w_bytes = jnp.dtype(weight_t.dtype).itemsize
    o_bytes = jnp.dtype(out_dtype).itemsize

    # ---- K (ft_in) tiling: single block is the common / fast path ----
    if block_k is None:
        tk, need_kpad = _choose_tk(ft_in)
    else:
        tk = min(int(block_k), ft_in)
        need_kpad = (ft_in % tk) != 0
    k_pad = _round_up(ft_in, tk)
    if need_kpad:
        # Rare path: garbage in a partial K block would contaminate real rows,
        # so pad both operands with zeros.
        seq = jnp.pad(seq, ((0, 0), (0, k_pad - ft_in)))
        weight_t = jnp.pad(weight_t, ((0, k_pad - ft_in), (0, 0)))
    k_tiles = k_pad // tk

    # ---- batch (M) tile ----
    row_align = {4: _SUBLANE, 2: 16, 1: 32}.get(x_bytes, _SUBLANE)  # packed-dtype sublanes
    budget, vmem_limit = _vmem_budget()
    if block_rows is None:
        n_vmem = _round_up(nb_classes, _LANE)          # VMEM lane padding of out/acc
        fixed = 2 * k_pad * n_vmem * w_bytes           # resident W (upper bound)
        per_row = 2 * tk * x_bytes + 2 * n_vmem * o_bytes + n_vmem * 4
        block_rows = max(row_align, (budget - fixed) // max(per_row, 1))
        block_rows = min(block_rows, _MAX_BLOCK_ROWS)
        # If B would be a single tile, split it in two so the "parallel" batch
        # axis can shard across v7x's 2 TensorCores (harmless on 1-TC gens).
        if B > 2 * row_align and block_rows >= B:
            block_rows = -(-B // 2)
    tm = min(_round_up(int(block_rows), row_align), _round_up(B, row_align))
    m_tiles = pl.cdiv(B, tm)

    cost = pl.CostEstimate(
        flops=2 * B * k_pad * nb_classes,
        transcendentals=0,
        bytes_accessed=(B * k_pad * x_bytes
                        + k_pad * nb_classes * w_bytes
                        + B * nb_classes * o_bytes),
    )

    if k_tiles == 1:
        kernel = _logreg_kernel_single
        grid = (m_tiles,)
        in_specs = [
            pl.BlockSpec((tm, tk), lambda i: (i, 0)),                # X tile
            pl.BlockSpec((k_pad, nb_classes), lambda i: (0, 0)),     # W (resident)
            pl.BlockSpec((1, nb_classes), lambda i: (0, 0)),         # bias (resident)
        ]
        out_specs = pl.BlockSpec((tm, nb_classes), lambda i: (i, 0))
        scratch_shapes = ()
        dim_sem = ("parallel",)
    else:
        kernel = functools.partial(_logreg_kernel_multi, tk=tk)
        grid = (m_tiles, k_tiles)
        in_specs = [
            pl.BlockSpec((tm, tk), lambda i, k: (i, k)),             # X tile
            pl.BlockSpec((k_pad, nb_classes), lambda i, k: (0, 0)),  # W fully resident
            pl.BlockSpec((1, nb_classes), lambda i, k: (0, 0)),      # bias (resident)
        ]
        out_specs = pl.BlockSpec((tm, nb_classes), lambda i, k: (i, 0))
        scratch_shapes = (pltpu.VMEM((tm, nb_classes), jnp.float32),)
        dim_sem = ("parallel", "arbitrary")

    return pl.pallas_call(
        kernel,
        out_shape=jax.ShapeDtypeStruct((B, nb_classes), out_dtype),  # no batch/lane pad
        grid=grid,
        in_specs=in_specs,
        out_specs=out_specs,
        scratch_shapes=scratch_shapes,
        compiler_params=pltpu.CompilerParams(
            dimension_semantics=dim_sem,
            vmem_limit_bytes=vmem_limit,
        ),
        cost_estimate=cost,
    )(seq, weight_t, bias2d)


def init_logreg_params(key, ft_in, nb_classes, dtype=jnp.float32):
    """Xavier-uniform init matching torch.nn.init.xavier_uniform_.

    Weight is stored pre-transposed as (ft_in, nb_classes) and bias as
    (1, nb_classes) so the forward pays no per-call transpose / reshape;
    semantics are identical to nn.Linear.
    """
    bound = (6.0 / (ft_in + nb_classes)) ** 0.5
    weight_t = jax.random.uniform(
        key, (ft_in, nb_classes), dtype=dtype, minval=-bound, maxval=bound
    )
    bias = jnp.zeros((1, nb_classes), dtype=dtype)  # bias.data.fill_(0.0)
    return weight_t, bias


if __name__ == "__main__":
    key = jax.random.PRNGKey(0)
    k1, k2, k3, k4 = jax.random.split(key, 4)

    # --- small shapes consistent with the module (single-block fast path) ---
    batch, ft_in, nb_classes = 8, 32, 8
    seq = jax.random.normal(k1, (batch, ft_in), dtype=jnp.float32)
    weight_t, bias = init_logreg_params(k2, ft_in, nb_classes)

    out = jax.block_until_ready(logreg_forward(seq, weight_t, bias))
    ref = seq @ weight_t + bias
    assert out.shape == (batch, nb_classes)
    assert jnp.allclose(out, ref, atol=1e-5, rtol=1e-5)

    # --- exercise ragged batch grid (no pad) + K-accumulation / resident-W path ---
    B2, ft2, nc2 = 200, 256, 10
    seq2 = jax.random.normal(k3, (B2, ft2), dtype=jnp.float32)
    w2, b2 = init_logreg_params(k4, ft2, nc2)
    out2 = jax.block_until_ready(
        logreg_forward(seq2, w2, b2, block_rows=64, block_k=128))
    ref2 = jnp.dot(seq2, w2, precision=jax.lax.Precision.HIGHEST) + b2
    assert out2.shape == (B2, nc2)
    assert jnp.allclose(out2, ref2, atol=2e-3, rtol=2e-3)

    print("KERNEL_OK")
</pallas_src>

<mosaic_0001>
module attributes {stable_mosaic.version = 11 : i64} {
  func.func @_logreg_kernel_single(%arg0: i32, %arg1: memref<8x32xf32, #tpu.memory_space<vmem>>, %arg2: memref<32x8xf32, #tpu.memory_space<vmem>>, %arg3: memref<1x8xf32, #tpu.memory_space<vmem>>, %arg4: memref<8x8xf32, #tpu.memory_space<vmem>>) attributes {dimension_semantics = [#tpu.dimension_semantics<parallel>], iteration_bounds = array<i64: 1>, scalar_prefetch = 0 : i64, scratch_operands = 0 : i64, tpu.core_type = #tpu.core_type<tc>, window_params = [{transform_indices = @transform_0, window_bounds = array<i64: 8, 32>}, {pipeline_mode = #tpu.pipeline_mode<synchronous>, transform_indices = @transform_1, window_bounds = array<i64: 32, 8>}, {pipeline_mode = #tpu.pipeline_mode<synchronous>, transform_indices = @transform_2, window_bounds = array<i64: 1, 8>}, {transform_indices = @transform_3, window_bounds = array<i64: 8, 8>}]} {
    %c0 = arith.constant 0 : index
    %c0_0 = arith.constant 0 : index
    %0 = vector.load %arg1[%c0, %c0_0] : memref<8x32xf32, #tpu.memory_space<vmem>>, vector<8x32xf32>
    %c0_1 = arith.constant 0 : index
    %c0_2 = arith.constant 0 : index
    %1 = vector.load %arg2[%c0_1, %c0_2] : memref<32x8xf32, #tpu.memory_space<vmem>>, vector<32x8xf32>
    %cst = arith.constant dense<0.000000e+00> : vector<8x8xf32>
    %2 = tpu.matmul %0, %1, %cst {dimension_numbers = #tpu.dot_dimension_numbers<[1], [0], [0], [1], [0, 0, 1, 1], [], []>} : vector<8x32xf32>, vector<32x8xf32>, vector<8x8xf32> -> vector<8x8xf32>
    %c0_3 = arith.constant 0 : index
    %c0_4 = arith.constant 0 : index
    %3 = vector.load %arg3[%c0_3, %c0_4] : memref<1x8xf32, #tpu.memory_space<vmem>>, vector<1x8xf32>
    %4 = vector.broadcast %3 : vector<1x8xf32> to vector<8x8xf32>
    %5 = arith.addf %2, %4 : vector<8x8xf32>
    %c0_5 = arith.constant 0 : index
    %c0_6 = arith.constant 0 : index
    %6 = vector.load %arg4[%c0_5, %c0_6] : memref<8x8xf32, #tpu.memory_space<vmem>>, vector<8x8xf32>
    tpu.vector_store %arg4[%c0_5, %c0_6], %5 {strides = array<i32>} : memref<8x8xf32, #tpu.memory_space<vmem>>, vector<8x8xf32>,
    return
  }
  func.func @transform_0(%arg0: i32) -> (i32, i32) {
    %c0_i32 = arith.constant 0 : i32
    %c0_i32_0 = arith.constant 0 : i32
    return %arg0, %c0_i32 : i32, i32
  }
  func.func @transform_1(%arg0: i32) -> (i32, i32) {
    %c0_i32 = arith.constant 0 : i32
    %c0_i32_0 = arith.constant 0 : i32
    %c0_i32_1 = arith.constant 0 : i32
    return %c0_i32, %c0_i32_0 : i32, i32
  }
  func.func @transform_2(%arg0: i32) -> (i32, i32) {
    %c0_i32 = arith.constant 0 : i32
    %c0_i32_0 = arith.constant 0 : i32
    %c0_i32_1 = arith.constant 0 : i32
    return %c0_i32, %c0_i32_0 : i32, i32
  }
  func.func @transform_3(%arg0: i32) -> (i32, i32) {
    %c0_i32 = arith.constant 0 : i32
    %c0_i32_0 = arith.constant 0 : i32
    return %arg0, %c0_i32 : i32, i32
  }
}

</mosaic_0001>

<bundles_post_ra>
// kernel: tpu_custom_call.1
= control target key start
LH: loop header
LB: loop body
LE: loop exit
PB: predicated region body
PF: predicated region fallthrough
CT: control target
= control target key end

     0   :  { %v169_v3 = vmov 0.0|0.0   ;;  %vm170_vm0 = vmmov 0   ;;  %v171_v6 = vmov 0.0   ;;  %s223_s0 = inlined_call_operand.vmem [shape: f32[8,32], index: 0, kind: input, shape index: {}]   ;;  %s224_s1 = inlined_call_operand.vmem [shape: f32[32,8], index: 1, kind: input, shape index: {}]   ;;  %s225_s2 = inlined_call_operand.vmem [shape: f32[1,8], index: 2, kind: input, shape index: {}]   ;;  %s226_s3 = inlined_call_operand.hbm [shape: f32[8,8], index: 3, kind: output, shape index: {}]  }
   0x1   :  { %v16_v0 = vld [vmem:[%s224_s1] sm:$0xff]  ;;  %v17_v1 = vld [vmem:[%s224_s1 + $0x8] sm:$0xff]  ;;  %v18_v2 = vld [vmem:[%s224_s1 + $0x10] sm:$0xff]  ;;  %135 = vmatprep.subr.bf16.mxu0 %v169_v3  ;;  %132 = vmatprep.mubr.msk.f32.mxu0 %vm170_vm0, %v171_v6 }
   0x2   :  { %v136_v4 = vpack.c.bf16 %v17_v1, %v16_v0  ;;  %v19_v5 = vld [vmem:[%s224_s1 + $0x18] sm:$0xff] }
   0x3   :  { %8 = vsyncpa [#allocation3], 0  ;;  %v139_v7 = vpack.c.bf16 %v19_v5, %v18_v2  ;;  %v15_v8 = vld [vmem:[%s223_s0] sm:$0xff]  ;;  %vm27_vm1 = vcmask 261120   ;;  %s172_s24 = smov [#allocation2]   ;;  %vm101_vm2 = vcmask 64512  }
   0x4   :  { %137 = vmatpush3.bf16.msra.mxu0 %v136_v4  ;;  %v117_v9 = vld [vmem:[%s225_s2] ss:$0 sm:$0xff]  ;;  %s109_s1 = sshll.u32 %s172_s24, 4  ;;  %s110_s1 = int_to_ptr.vmem [resolvable:$true] %s109_s1 }
   0x5   :  { %138 = vmatprep.subr.bf16.mxu0 %v169_v3  ;;  %s145_s25 = scalar_lea.vmem %s110_s1, 128  ;;  %p150_p1 = scmp.lt.s32.totalorder %s110_s1, %s110_s1 }
   0x6   :  { %p146_p0 = scmp.ne.s32.totalorder %s110_s1, %s145_s25  ;;  %p151_p2 = scmp.lt.s32.totalorder %s145_s25, %s145_s25 }
   0x8   :  { %140 = vmatpush3.bf16.msra.mxu0 %v139_v7  ;;  %p152_p3 = por %p151_p2, %p150_p1 }
   0xa   :  { %p153_p4 = pnand %p152_p3, %p146_p0 }
   0xb   :  { %133 = vmatmul.mubr.msk.f32.vlgmr.msra.gmra.mrb[0].mxu0 %vm27_vm1, %v15_v8 }
  0xde   :  { %v97_v10 = vpop.f32.mrb[0].mxu0 }
  0xdf   :  { %v98_v11 = vadd.f32 %v117_v9, %v97_v10  ;;  %v134_v12 = vpop.f32.mrb[1].mxu0 }
  0xe1   :  { %102 = vst.msk [vmem:[#allocation2] sm:$0xff] %vm101_vm2, %v98_v11 }
  0xe2   :  { %156 = shalt.err (!%p153_p4)
}
  0xe3   :  { %s157_s27 = scalar_lea.hbm %s226_s3, 128 }
  0xe4   :  { %p158_p5 = scmp.ne.s32.totalorder %s226_s3, %s157_s27  ;;  %p161_p6 = scmp.lt.u32.totalorder %s157_s27, %s226_s3 }
  0xe6   :  { %p163_p7 = pnand %p161_p6, %p158_p5 }
  0xe8   :  { %166 = shalt.err (!%p163_p7)
}
  0xe9   :  { %112 = dma.vmem_to_hbm [thread:$0]  %s110_s1, 128, %s226_s3, [#allocation3]  }
  0xea   :  { %167 = dma.done.wait [#allocation3], 128  }
  0xeb   :  { %168 = vsyncadd [#allocation3], 4294967168 }
  0xec   :  { %116 = vsyncpa [#allocation3], 1 }

</bundles_post_ra>
